<compile_context>
chip_gen: v6e
topology: v6e:2x2x1
jax: 0.10.0
libtpu: 0.0.40
codegen_flags: <defaults>
</compile_context>

<pallas_src>
import jax
import jax.numpy as jnp
from jax.experimental import pallas as pl
from jax.experimental.pallas import tpu as pltpu


def _bcast_row_kernel(row_ref, out_ref):
    # row_ref: (1, work_cols)        -- lane-dense source row (VMEM resident,
    #                                   same block every grid step)
    # out_ref: (tile_rows, work_cols) -- one row-tile of the output
    # Single full-block, lane-contiguous store; sublane-broadcast of one row.
    out_ref[...] = jnp.broadcast_to(row_ref[...], out_ref.shape)


def binance_perp_output_embedding(price_weight, size_weight, num_target_features,
                                  *, tile_bytes=4 * 1024 * 1024,
                                  small_bytes_threshold=256 * 1024,
                                  force_pallas=False):
    """price_weight, size_weight: [1, embed_dim//2] float32 embedding tables.

    Returns [num_target_features, embed_dim] float32 (each row identical,
    matching torch.stack of N copies of cat(price_row, size_row))."""
    half = price_weight.shape[-1]
    embed_dim = 2 * half
    n = int(num_target_features)

    # Concatenate once in the wrapper -> single kernel input, single DMA.
    row = jnp.concatenate(
        [price_weight.reshape(1, half).astype(jnp.float32),
         size_weight.reshape(1, half).astype(jnp.float32)],
        axis=1,
    )

    out_bytes = n * embed_dim * 4
    if out_bytes <= small_bytes_threshold and not force_pallas:
        # Tiny output: pallas_call launch + grid-step overhead dwarfs the
        # actual HBM write; let XLA fuse the broadcast into the consumer.
        return jnp.broadcast_to(row, (n, embed_dim))

    # ---- choose a lane-dense working layout -------------------------------
    if embed_dim < 128 and 128 % embed_dim == 0:
        # Pack `per_row` logical rows into each 128-lane physical row so every
        # store is a full unmasked vst.
        per_row = 128 // embed_dim
        work_cols = 128
        n_work = pl.cdiv(n, per_row)            # number of 128-lane rows
        src = jnp.tile(row, (1, per_row))        # (1, 128)
        repack = True
    else:
        # embed_dim is already a multiple of 128 (lane-dense) or can't be
        # packed cleanly -> keep the natural layout.
        per_row = 1
        work_cols = embed_dim
        n_work = n
        src = row
        repack = False

    # ---- byte-budgeted row tiling ------------------------------------------
    row_bytes = work_cols * 4
    tile_rows = max(8, (tile_bytes // row_bytes) // 8 * 8)      # multiple of 8
    tile_rows = min(tile_rows, max(8, -(-n_work // 8) * 8))     # no oversizing
    grid = (pl.cdiv(n_work, tile_rows),)

    out = pl.pallas_call(
        _bcast_row_kernel,
        out_shape=jax.ShapeDtypeStruct((n_work, work_cols), jnp.float32),
        grid_spec=pltpu.PrefetchScalarGridSpec(
            num_scalar_prefetch=0,
            grid=grid,
            # Source row stays resident (same block every grid step).
            in_specs=[pl.BlockSpec((1, work_cols), lambda i: (0, 0))],
            # Row-tiled, lane-dense output blocks.
            out_specs=pl.BlockSpec((tile_rows, work_cols), lambda i: (i, 0)),
        ),
        compiler_params=pltpu.CompilerParams(
            dimension_semantics=("parallel",),
            vmem_limit_bytes=64 * 1024 * 1024,
        ),
        cost_estimate=pl.CostEstimate(
            flops=0,
            transcendentals=0,
            bytes_accessed=n_work * work_cols * 4 + work_cols * 4,
        ),
    )(src)

    if repack:
        out = out.reshape(n_work * per_row, embed_dim)
        if n_work * per_row != n:
            out = out[:n]
    return out


if __name__ == "__main__":
    embed_dim = 32              # module's embed_dim
    num_target_features = 8     # forward() argument

    # Deterministic parameter init (nn.Embedding default: N(0, 1)).
    key = jax.random.PRNGKey(0)
    k_price, k_size = jax.random.split(key)
    perp_price_embed_weight = jax.random.normal(
        k_price, (1, embed_dim // 2), dtype=jnp.float32)
    perp_size_embed_weight = jax.random.normal(
        k_size, (1, embed_dim // 2), dtype=jnp.float32)

    ref_row = jnp.concatenate(
        [perp_price_embed_weight[0], perp_size_embed_weight[0]], axis=0)

    # 1) Default path at the module's real size -> small-size fast path (jnp).
    out_small = jax.block_until_ready(binance_perp_output_embedding(
        perp_price_embed_weight, perp_size_embed_weight, num_target_features))
    ref_small = jnp.broadcast_to(ref_row, (num_target_features, embed_dim))
    assert out_small.shape == (num_target_features, embed_dim)
    assert out_small.dtype == jnp.float32
    assert bool(jnp.allclose(out_small, ref_small))

    # 2) Pallas kernel path at the same small size (forced), so the kernel is
    #    actually compiled and run on TPU.
    out_pallas = jax.block_until_ready(binance_perp_output_embedding(
        perp_price_embed_weight, perp_size_embed_weight, num_target_features,
        force_pallas=True))
    assert out_pallas.shape == (num_target_features, embed_dim)
    assert out_pallas.dtype == jnp.float32
    assert bool(jnp.allclose(out_pallas, ref_small))

    # 3) Larger N (not a multiple of 128/embed_dim) to exercise the lane-dense
    #    repack + row-padding/slice path.
    n_big = 1001
    out_big = jax.block_until_ready(binance_perp_output_embedding(
        perp_price_embed_weight, perp_size_embed_weight, n_big,
        force_pallas=True))
    ref_big = jnp.broadcast_to(ref_row, (n_big, embed_dim))
    assert out_big.shape == (n_big, embed_dim)
    assert bool(jnp.allclose(out_big, ref_big))

    print("KERNEL_OK")
</pallas_src>

<mosaic_0001>
module attributes {stable_mosaic.version = 11 : i64} {
  func.func @_bcast_row_kernel(%arg0: i32, %arg1: memref<1x128xf32, #tpu.memory_space<vmem>>, %arg2: memref<8x128xf32, #tpu.memory_space<vmem>>) attributes {dimension_semantics = [#tpu.dimension_semantics<parallel>], iteration_bounds = array<i64: 1>, scalar_prefetch = 0 : i64, scratch_operands = 0 : i64, tpu.core_type = #tpu.core_type<tc>, window_params = [{pipeline_mode = #tpu.pipeline_mode<synchronous>, transform_indices = @transform_0, window_bounds = array<i64: 1, 128>}, {transform_indices = @transform_1, window_bounds = array<i64: 8, 128>}]} {
    %c0 = arith.constant 0 : index
    %c0_0 = arith.constant 0 : index
    %0 = vector.load %arg1[%c0, %c0_0] : memref<1x128xf32, #tpu.memory_space<vmem>>, vector<1x128xf32>
    %1 = vector.shape_cast %0 : vector<1x128xf32> to vector<1x128xf32>
    %2 = vector.broadcast %1 : vector<1x128xf32> to vector<8x128xf32>
    %c0_1 = arith.constant 0 : index
    %c0_2 = arith.constant 0 : index
    %3 = vector.load %arg2[%c0_1, %c0_2] : memref<8x128xf32, #tpu.memory_space<vmem>>, vector<8x128xf32>
    tpu.vector_store %arg2[%c0_1, %c0_2], %2 {strides = array<i32>} : memref<8x128xf32, #tpu.memory_space<vmem>>, vector<8x128xf32>,
    return
  }
  func.func @transform_0(%arg0: i32) -> (i32, i32) {
    %c0_i32 = arith.constant 0 : i32
    %c0_i32_0 = arith.constant 0 : i32
    %c0_i32_1 = arith.constant 0 : i32
    return %c0_i32, %c0_i32_0 : i32, i32
  }
  func.func @transform_1(%arg0: i32) -> (i32, i32) {
    %c0_i32 = arith.constant 0 : i32
    %c0_i32_0 = arith.constant 0 : i32
    return %arg0, %c0_i32 : i32, i32
  }
}

</mosaic_0001>

<bundles_post_ra>
// kernel: tpu_custom_call.1
= control target key start
LH: loop header
LB: loop body
LE: loop exit
PB: predicated region body
PF: predicated region fallthrough
CT: control target
= control target key end

     0   :  { %6 = vsyncpa [#allocation3], 0  ;;  %s115_s0 = inlined_call_operand.hbm [shape: f32[1,128], index: 0, kind: input, shape index: {}]   ;;  %s116_s1 = inlined_call_operand.hbm [shape: f32[2,128], index: 1, kind: output, shape index: {}]  }
   0x1   :  { %7 = vsyncpa [#allocation4], 0  ;;  %s95_s6 = smov [#allocation2]  }
   0x2   :  { %s14_s7 = sshll.u32 %s95_s6, 4  ;;  %s15_s7 = int_to_ptr.vmem [resolvable:$true] %s14_s7 }
   0x3   :  { %s59_s8 = scalar_lea.vmem %s15_s7, 16  ;;  %s63_s9 = scalar_lea.vmem %s15_s7, 32 }
   0x4   :  { %p60_p0 = scmp.ne.s32.totalorder %s15_s7, %s59_s8  ;;  %p64_p1 = scmp.lt.s32.totalorder %s15_s7, %s15_s7 }
   0x5   :  { %p65_p2 = scmp.lt.s32.totalorder %s63_s9, %s59_s8 }
   0x7   :  { %p66_p3 = por %p65_p2, %p64_p1 }
   0x9   :  { %p67_p4 = pnand %p66_p3, %p60_p0 }
   0xb   :  { %70 = shalt.err (!%p67_p4)
}
   0xc   :  { %17 = dma.hbm_to_vmem [thread:$0]  %s115_s0, 16, %s15_s7, [#allocation3]  }
   0xd   :  { %91 = dma.done.wait [#allocation3], 16  }
   0xe   :  { %92 = vsyncadd [#allocation3], 4294967280  ;;  %v46_v0 = vld [vmem:[#allocation2] ss:$0 sm:$0xff] }
   0xf   :  { %28 = vst [vmem:[#allocation5] sm:$0xff] %v46_v0 }
  0x10   :  { %33 = vsyncadd [#allocation4], 96  ;;  %s96_s12 = smov [#allocation5]  }
  0x11   :  { %s34_s13 = sshll.u32 %s96_s12, 4  ;;  %s35_s13 = int_to_ptr.vmem [resolvable:$true] %s34_s13 }
  0x12   :  { %s71_s14 = scalar_lea.vmem %s35_s13, 32  ;;  %s75_s15 = scalar_lea.vmem %s35_s13, 128 }
  0x13   :  { %p72_p5 = scmp.ne.s32.totalorder %s35_s13, %s71_s14  ;;  %p76_p6 = scmp.lt.s32.totalorder %s35_s13, %s35_s13 }
  0x14   :  { %p77_p7 = scmp.lt.s32.totalorder %s75_s15, %s71_s14 }
  0x16   :  { %p78_p8 = por %p77_p7, %p76_p6 }
  0x18   :  { %p79_p9 = pnand %p78_p8, %p72_p5 }
  0x1a   :  { %82 = shalt.err (!%p79_p9)
}
  0x1b   :  { %s97_s16 = smov 32   ;;  %s98_s17 = smov 2  }
  0x1c   :  { %40 = dma.vmem_to_hbm [thread:$0]  %s35_s13, 32, %s116_s1, [#allocation4], %s97_s16, %s97_s16, %s98_s17  }
  0x1d   :  { %93 = dma.done.wait [#allocation4], 128  }
  0x1e   :  { %94 = vsyncadd [#allocation4], 4294967168 }
  0x1f   :  { %44 = vsyncpa [#allocation3], 1 }
  0x20   :  { %45 = vsyncpa [#allocation4], 1 }

</bundles_post_ra>
